<compile_context>
chip_gen: v5e
topology: v5e:2x2
jax: 0.10.0
libtpu: 0.0.40
codegen_flags: <defaults>
</compile_context>

<pallas_src>
import numpy as np
import jax
import jax.numpy as jnp
from jax.experimental import pallas as pl
from jax.experimental.pallas import tpu as pltpu
from jax.scipy.special import erf as _erf_exact

# ----- small configuration (LMDA defaults scaled down) -----
B = 2            # batch
CHANS = 8        # EEG channels  (H of NCHW)
SAMPLES = 64     # time samples  (W of NCHW)
DEPTH = 4        # depth of channel_weight
KERNEL = 7       # temporal conv kernel
CD1 = 8          # channel_depth1
CD2 = 4          # channel_depth2
AVEPOOL = 4
NUM_CLASSES = 2
KATT = 7         # EEGDepthAttention kernel size k

W1 = SAMPLES - KERNEL + 1        # width after valid temporal conv          (58)
WP = W1 // AVEPOOL               # width after AvgPool3d((1,1,AVEPOOL))     (14)
FEAT = CD2 * 1 * WP              # flattened feature size fed to classifier (56)

RC = CD1 * CHANS                 # flattened (feature, chan) rows           (64)
KC = KERNEL * CHANS              # stacked-slice contraction rows           (56)

# ----- packed constant slab layout: single (SLAB_ROWS, 128) f32 operand -----
SLAB_COLS = 128
R_WT, C_WT = 0, 0                # W_time  rows 0:RC        cols 0:KC
C_BT = KC                        # bt      rows 0:RC        col  KC
C_R = 64                         # R (softmax row-replication) rows 0:RC, cols 64:64+CD1
R_MP, C_MP = RC, 0               # MP      rows RC:RC+CD1   cols 0:RC
R_WFC, C_WFC = RC, 64            # Wfc     rows RC:RC+NC*CD2 cols 64:64+W1
R_G = RC + ((max(CD1, NUM_CLASSES * CD2) + 7) // 8) * 8
C_G, C_BC = 0, 64                # G rows R_G:R_G+CD2 cols 0:RC ; bc col 64
SLAB_ROWS = ((R_G + CD2 + 7) // 8) * 8

assert C_BT < C_R and C_R + CD1 <= SLAB_COLS
assert C_WFC + W1 <= SLAB_COLS and C_G + RC <= SLAB_COLS

INV_SQRT2 = 0.7071067811865476


# ----- in-kernel elementwise helpers -----
def _erf_approx(x):
    # Abramowitz & Stegun 7.1.26, |err| < 1.5e-7 (float32-level accuracy).
    a1, a2, a3, a4, a5 = (0.254829592, -0.284496736, 1.421413741,
                          -1.453152027, 1.061405429)
    p = 0.3275911
    s = jnp.where(x >= 0.0, 1.0, -1.0)
    ax = jnp.abs(x)
    t = 1.0 / (1.0 + p * ax)
    poly = ((((a5 * t + a4) * t + a3) * t + a2) * t + a1) * t
    return s * (1.0 - poly * jnp.exp(-ax * ax))


def _gelu(x):
    # exact-erf GELU (PyTorch default approximate='none')
    return 0.5 * x * (1.0 + _erf_approx(x * INV_SQRT2))


# =====================================================================
# Single fused kernel (one batch element per grid step), fully 2-D:
#   time stage        : stacked-slice matmul (64,56)@(56,58) + bias + GELU
#   depth attention   : pooled band matmul (8,64)@(64,58), softmax,
#                       replication matmul (64,8)@(8,58), elementwise scale
#   channel stage     : (4,64)@(64,58) matmul + bias + GELU
#   pool+flatten+FC   : per-class weighted reduction against folded Wfc
# =====================================================================
def lmda_kernel(x_ref, c_ref, o_ref):
    x = x_ref[0]                                              # (CHANS, SAMPLES)

    # ---------------- time stage (one MXU matmul) ----------------
    # stacked-slice matrix: row t*CHANS + c  ==  x[c, t : t + W1]
    xs = jnp.concatenate([x[:, t:t + W1] for t in range(KERNEL)], axis=0)   # (KC, W1)
    w_time = c_ref[R_WT:R_WT + RC, C_WT:C_WT + KC]            # (RC, KC)
    bt = c_ref[R_WT:R_WT + RC, C_BT:C_BT + 1]                 # (RC, 1)
    x_time = _gelu(jnp.dot(w_time, xs,
                           preferred_element_type=jnp.float32) + bt)        # (RC, W1)

    # ---------------- EEGDepthAttention ----------------
    # CHANS-mean pooling folded into the banded conv matrix (MP); the conv bias is
    # uniform over the softmax axis and cancels, so it is dropped here.
    mp = c_ref[R_MP:R_MP + CD1, C_MP:C_MP + RC]               # (CD1, RC)
    y = jnp.dot(mp, x_time, preferred_element_type=jnp.float32)             # (CD1, W1)
    m = jnp.max(y, axis=0, keepdims=True)                     # softmax over feature axis
    e = jnp.exp(y - m)
    sm = e * pl.reciprocal(jnp.sum(e, axis=0, keepdims=True), approx=True)
    rmat = c_ref[R_WT:R_WT + RC, C_R:C_R + CD1]               # (RC, CD1) 0/1 replication
    sm_flat = jnp.dot(rmat, sm, preferred_element_type=jnp.float32)          # (RC, W1)
    att = sm_flat * x_time                                    # (*C factor folded into G)

    # ---------------- channel stage (one MXU matmul) ----------------
    g = c_ref[R_G:R_G + CD2, C_G:C_G + RC]                    # (CD2, RC)
    bc = c_ref[R_G:R_G + CD2, C_BC:C_BC + 1]                  # (CD2, 1)
    h = _gelu(jnp.dot(g, att, preferred_element_type=jnp.float32) + bc)      # (CD2, W1)

    # ---------------- AvgPool + flatten + Linear (fused weights) ----------------
    # Dropout(p=0.65) == identity in inference mode; classifier bias added in wrapper.
    cols = []
    for n in range(NUM_CLASSES):
        wfc_n = c_ref[R_WFC + n * CD2:R_WFC + (n + 1) * CD2, C_WFC:C_WFC + W1]
        ln = jnp.sum(jnp.sum(wfc_n * h, axis=1, keepdims=True),
                     axis=0, keepdims=True)                    # (1, 1)
        cols.append(ln)
    o_ref[0] = jnp.concatenate(cols, axis=1)                  # (1, NUM_CLASSES)


# ----- wrapper: one pallas_call, grid over batch ("parallel" for v7x megacore) -----
@jax.jit
def lmda_forward(x, slab, bl):
    x3 = x[:, 0]                                              # (B, CHANS, SAMPLES)
    out = pl.pallas_call(
        lmda_kernel,
        out_shape=jax.ShapeDtypeStruct((B, 1, NUM_CLASSES), jnp.float32),
        grid=(B,),
        in_specs=[
            pl.BlockSpec((1, CHANS, SAMPLES), lambda b: (b, 0, 0)),   # x
            pl.BlockSpec((SLAB_ROWS, SLAB_COLS), lambda b: (0, 0)),   # packed constants
        ],
        out_specs=pl.BlockSpec((1, 1, NUM_CLASSES), lambda b: (b, 0, 0)),
        compiler_params=pltpu.CompilerParams(
            dimension_semantics=("parallel",)),
    )(x3, slab)
    return out[:, 0, :] + bl[None, :]                         # (B, NUM_CLASSES)


# ----- deterministic parameter construction (glue, plain JAX/NumPy) -----
def _bn_fold_np(gamma, beta, mean, var, eps=1e-5):
    s = gamma / np.sqrt(var + eps)
    return s.astype(np.float32), (beta - mean * s).astype(np.float32)


def init_params(key):
    ks = jax.random.split(key, 7)
    f32 = jnp.float32
    cw = jax.random.normal(ks[0], (DEPTH, CHANS), f32) * 0.3        # channel_weight[:,0,:]
    w1 = jax.random.normal(ks[1], (CD1, DEPTH), f32) * 0.3          # Conv2d(depth,cd1,(1,1))
    dw = jax.random.normal(ks[2], (CD1, KERNEL), f32) * 0.3         # depthwise (1,KERNEL)
    kw = jax.random.normal(ks[3], (KATT,), f32) * 0.3               # attention conv
    b_att = jnp.zeros((1,), f32)                                    # zero-init (PyTorch init)
    w2 = jax.random.normal(ks[4], (CD2, CD1), f32) * 0.3            # Conv2d(cd1,cd2,(1,1))
    dw2 = jax.random.normal(ks[5], (CD2, CHANS), f32) * 0.3         # depthwise (CHANS,1)
    w_cls = jax.random.normal(ks[6], (NUM_CLASSES, FEAT), f32) * 0.1
    b_cls = jnp.zeros((NUM_CLASSES,), f32)

    one, zero = (lambda n: np.ones(n, np.float32)), (lambda n: np.zeros(n, np.float32))
    s1, b1 = _bn_fold_np(one(CD1), zero(CD1), zero(CD1), one(CD1))
    s2, b2 = _bn_fold_np(one(CD1), zero(CD1), zero(CD1), one(CD1))
    s3, b3 = _bn_fold_np(one(CD2), zero(CD2), zero(CD2), one(CD2))
    s4, b4 = _bn_fold_np(one(CD2), zero(CD2), zero(CD2), one(CD2))

    cw_n, w1_n, dw_n = map(np.asarray, (cw, w1, dw))
    w2_n, dw2_n, kw_n, wcls_n = map(np.asarray, (w2, dw2, kw, w_cls))

    # time stage: channel_weight einsum + 1x1 depth conv + BN1/BN2 folded into a
    # per-row (feature*chan) stacked-slice weight matrix + bias
    E = (s1 * s2)[:, None] * (w1_n @ cw_n)                          # (CD1, CHANS)
    bt = s2 * b1 * dw_n.sum(axis=1) + b2                            # (CD1,)
    w_time = np.zeros((RC, KC), np.float32)
    for k in range(CD1):
        for c in range(CHANS):
            w_time[k * CHANS + c, np.arange(KERNEL) * CHANS + c] = E[k, c] * dw_n[k, :]

    # banded attention conv (zero padding) with the 1/CHANS pooling folded in
    M = np.zeros((CD1, CD1), np.float32)
    for f in range(CD1):
        for i in range(KATT):
            j = f + i - KATT // 2
            if 0 <= j < CD1:
                M[f, j] = kw_n[i]
    MP = (np.repeat(M, CHANS, axis=1) / CHANS).astype(np.float32)   # (CD1, RC)

    # channel stage: (*C factor) * BN3/BN4 scales * 1x1 conv * depthwise (CHANS,1) conv
    G = (float(CD1) * s3 * s4)[:, None, None] * w2_n[:, :, None] * dw2_n[:, None, :]
    G = G.reshape(CD2, RC).astype(np.float32)
    bc = s4 * b3 * dw2_n.sum(axis=1) + b4                           # (CD2,)

    # AvgPool3d((1,1,AVEPOOL)) + flatten + Linear fused into a (NC, CD2, W1) weight slab
    wcr = wcls_n.reshape(NUM_CLASSES, CD2, WP)
    Wfc = np.zeros((NUM_CLASSES, CD2, W1), np.float32)
    for t in range(WP * AVEPOOL):                # trailing remainder dropped (PyTorch floor)
        Wfc[:, :, t] = wcr[:, :, t // AVEPOOL] / AVEPOOL

    # ---- pack everything into the single constant slab ----
    slab = np.zeros((SLAB_ROWS, SLAB_COLS), np.float32)
    slab[R_WT:R_WT + RC, C_WT:C_WT + KC] = w_time
    slab[R_WT:R_WT + RC, C_BT] = np.repeat(bt.astype(np.float32), CHANS)
    rows = np.arange(RC)
    slab[rows, C_R + rows // CHANS] = 1.0                           # softmax replication
    slab[R_MP:R_MP + CD1, C_MP:C_MP + RC] = MP
    slab[R_WFC:R_WFC + NUM_CLASSES * CD2, C_WFC:C_WFC + W1] = Wfc.reshape(
        NUM_CLASSES * CD2, W1)
    slab[R_G:R_G + CD2, C_G:C_G + RC] = G
    slab[R_G:R_G + CD2, C_BC] = bc.astype(np.float32)

    return dict(
        # raw parameters (used by the pure-JAX reference)
        cw=cw, w1=w1, dw=dw, w2=w2, dw2=dw2, kw=kw, b_att=b_att,
        s1=jnp.asarray(s1), b1=jnp.asarray(b1), s2=jnp.asarray(s2), b2=jnp.asarray(b2),
        s3=jnp.asarray(s3), b3=jnp.asarray(b3), s4=jnp.asarray(s4), b4=jnp.asarray(b4),
        w_cls=w_cls, b_cls=b_cls,
        # fused parameters (fed to the Pallas kernel)
        slab=jnp.asarray(slab), bl=b_cls,
    )


# ----- pure-JAX reference (mirrors the PyTorch forward, exact erf GELU) -----
def reference_forward(x, g):
    prec = jax.lax.Precision.HIGHEST
    gelu = lambda v: 0.5 * v * (1.0 + _erf_exact(v * INV_SQRT2))
    s1, b1, s2, b2 = g["s1"], g["b1"], g["s2"], g["b2"]
    s3, b3, s4, b4 = g["s3"], g["b3"], g["s4"], g["b4"]

    xb = x[:, 0]                                                 # (B, CHANS, SAMPLES)
    y = g["cw"][None, :, :, None] * xb[:, None, :, :]            # einsum bdcw,hdc->bhcw (d==1)
    z = jnp.einsum("bdcw,kd->bkcw", y, g["w1"], precision=prec)
    z = z * s1[None, :, None, None] + b1[None, :, None, None]
    acc = jnp.zeros((B, CD1, CHANS, W1), jnp.float32)
    for t in range(KERNEL):
        acc = acc + z[:, :, :, t:t + W1] * g["dw"][None, :, None, t:t + 1]
    x_time = gelu(acc * s2[None, :, None, None] + b2[None, :, None, None])

    x_pool = x_time.mean(axis=2)                                 # (B, CD1, W1)
    xp = jnp.pad(x_pool, ((0, 0), (KATT // 2, KATT // 2), (0, 0)))
    yatt = jnp.zeros((B, CD1, W1), jnp.float32) + g["b_att"][0]
    for t in range(KATT):
        yatt = yatt + g["kw"][t] * xp[:, t:t + CD1, :]
    sm = jax.nn.softmax(yatt, axis=1)
    att = sm[:, :, None, :] * float(CD1) * x_time

    z2 = jnp.einsum("bkcw,mk->bmcw", att, g["w2"], precision=prec)
    z2 = z2 * s3[None, :, None, None] + b3[None, :, None, None]
    h = jnp.sum(z2 * g["dw2"][None, :, :, None], axis=2)         # (B, CD2, W1)
    h = gelu(h * s4[None, :, None] + b4[None, :, None])
    hpool = h[:, :, :WP * AVEPOOL].reshape(B, CD2, WP, AVEPOOL).mean(axis=3)
    feat = hpool.reshape(B, FEAT)
    return jnp.einsum("bf,nf->bn", feat, g["w_cls"], precision=prec) + g["b_cls"][None, :]


if __name__ == "__main__":
    key = jax.random.PRNGKey(0)
    kx, kp = jax.random.split(key)
    x = jax.random.normal(kx, (B, 1, CHANS, SAMPLES), jnp.float32)
    params = init_params(kp)

    logits = jax.block_until_ready(lmda_forward(x, params["slab"], params["bl"]))
    assert logits.shape == (B, NUM_CLASSES)

    ref = np.asarray(reference_forward(x, params))
    if not np.allclose(np.asarray(logits), ref, rtol=1e-3, atol=1e-3):
        raise AssertionError(f"mismatch: kernel={np.asarray(logits)} ref={ref}")
    print("KERNEL_OK")
</pallas_src>

<mosaic_0001>
module attributes {stable_mosaic.version = 11 : i64} {
  func.func @lmda_kernel(%arg0: i32, %arg1: memref<1x8x64xf32, #tpu.memory_space<vmem>>, %arg2: memref<80x128xf32, #tpu.memory_space<vmem>>, %arg3: memref<1x1x2xf32, #tpu.memory_space<vmem>>) attributes {dimension_semantics = [#tpu.dimension_semantics<parallel>], iteration_bounds = array<i64: 2>, scalar_prefetch = 0 : i64, scratch_operands = 0 : i64, tpu.core_type = #tpu.core_type<tc>, window_params = [{transform_indices = @transform_0, window_bounds = array<i64: 1, 8, 64>}, {pipeline_mode = #tpu.pipeline_mode<synchronous>, transform_indices = @transform_1, window_bounds = array<i64: 80, 128>}, {transform_indices = @transform_2, window_bounds = array<i64: 1, 1, 2>}]} {
    %c0 = arith.constant 0 : index
    %c0_0 = arith.constant 0 : index
    %c0_1 = arith.constant 0 : index
    %0 = vector.load %arg1[%c0, %c0_0, %c0_1] : memref<1x8x64xf32, #tpu.memory_space<vmem>>, vector<1x8x64xf32>
    %1 = vector.shape_cast %0 : vector<1x8x64xf32> to vector<8x64xf32>
    %2 = vector.extract_strided_slice %1 {offsets = [0, 0], sizes = [8, 58], strides = [1, 1]} : vector<8x64xf32> to vector<8x58xf32>
    %3 = vector.extract_strided_slice %1 {offsets = [0, 1], sizes = [8, 58], strides = [1, 1]} : vector<8x64xf32> to vector<8x58xf32>
    %4 = vector.extract_strided_slice %1 {offsets = [0, 2], sizes = [8, 58], strides = [1, 1]} : vector<8x64xf32> to vector<8x58xf32>
    %5 = vector.extract_strided_slice %1 {offsets = [0, 3], sizes = [8, 58], strides = [1, 1]} : vector<8x64xf32> to vector<8x58xf32>
    %6 = vector.extract_strided_slice %1 {offsets = [0, 4], sizes = [8, 58], strides = [1, 1]} : vector<8x64xf32> to vector<8x58xf32>
    %7 = vector.extract_strided_slice %1 {offsets = [0, 5], sizes = [8, 58], strides = [1, 1]} : vector<8x64xf32> to vector<8x58xf32>
    %8 = vector.extract_strided_slice %1 {offsets = [0, 6], sizes = [8, 58], strides = [1, 1]} : vector<8x64xf32> to vector<8x58xf32>
    %9 = tpu.concatenate %2, %3, %4, %5, %6, %7, %8 in 0 : vector<8x58xf32>, vector<8x58xf32>, vector<8x58xf32>, vector<8x58xf32>, vector<8x58xf32>, vector<8x58xf32>, vector<8x58xf32> -> vector<56x58xf32>
    %c0_2 = arith.constant 0 : index
    %c0_3 = arith.constant 0 : index
    %10 = vector.load %arg2[%c0_2, %c0_3] : memref<80x128xf32, #tpu.memory_space<vmem>>, vector<64x56xf32>
    %c0_4 = arith.constant 0 : index
    %c56 = arith.constant 56 : index
    %11 = vector.load %arg2[%c0_4, %c56] : memref<80x128xf32, #tpu.memory_space<vmem>>, vector<64x1xf32>
    %cst = arith.constant dense<0.000000e+00> : vector<64x58xf32>
    %12 = tpu.matmul %10, %9, %cst {dimension_numbers = #tpu.dot_dimension_numbers<[1], [0], [0], [1], [0, 0, 1, 1], [], []>} : vector<64x56xf32>, vector<56x58xf32>, vector<64x58xf32> -> vector<64x58xf32>
    %13 = vector.broadcast %11 : vector<64x1xf32> to vector<64x58xf32>
    %14 = arith.addf %12, %13 : vector<64x58xf32>
    %cst_5 = arith.constant 5.000000e-01 : f32
    %15 = vector.broadcast %cst_5 : f32 to vector<64x58xf32>
    %16 = arith.mulf %15, %14 : vector<64x58xf32>
    %cst_6 = arith.constant 0.707106769 : f32
    %17 = vector.broadcast %cst_6 : f32 to vector<64x58xf32>
    %18 = arith.mulf %14, %17 : vector<64x58xf32>
    %cst_7 = arith.constant 0.000000e+00 : f32
    %19 = vector.broadcast %cst_7 : f32 to vector<64x58xf32>
    %20 = arith.cmpf oge, %18, %19 : vector<64x58xf32>
    %cst_8 = arith.constant 1.000000e+00 : f32
    %cst_9 = arith.constant -1.000000e+00 : f32
    %21 = vector.broadcast %cst_8 : f32 to vector<64x58xf32>
    %22 = vector.broadcast %cst_9 : f32 to vector<64x58xf32>
    %23 = arith.select %20, %21, %22 : vector<64x58xi1>, vector<64x58xf32>
    %24 = math.absf %18 : vector<64x58xf32>
    %cst_10 = arith.constant 0.327591091 : f32
    %25 = vector.broadcast %cst_10 : f32 to vector<64x58xf32>
    %26 = arith.mulf %25, %24 : vector<64x58xf32>
    %cst_11 = arith.constant 1.000000e+00 : f32
    %27 = vector.broadcast %cst_11 : f32 to vector<64x58xf32>
    %28 = arith.addf %27, %26 : vector<64x58xf32>
    %cst_12 = arith.constant 1.000000e+00 : f32
    %29 = vector.broadcast %cst_12 : f32 to vector<64x58xf32>
    %30 = arith.divf %29, %28 : vector<64x58xf32>
    %cst_13 = arith.constant 1.06140542 : f32
    %31 = vector.broadcast %cst_13 : f32 to vector<64x58xf32>
    %32 = arith.mulf %31, %30 : vector<64x58xf32>
    %cst_14 = arith.constant -1.45315206 : f32
    %33 = vector.broadcast %cst_14 : f32 to vector<64x58xf32>
    %34 = arith.addf %32, %33 : vector<64x58xf32>
    %35 = arith.mulf %34, %30 : vector<64x58xf32>
    %cst_15 = arith.constant 1.42141378 : f32
    %36 = vector.broadcast %cst_15 : f32 to vector<64x58xf32>
    %37 = arith.addf %35, %36 : vector<64x58xf32>
    %38 = arith.mulf %37, %30 : vector<64x58xf32>
    %cst_16 = arith.constant -0.284496725 : f32
    %39 = vector.broadcast %cst_16 : f32 to vector<64x58xf32>
    %40 = arith.addf %38, %39 : vector<64x58xf32>
    %41 = arith.mulf %40, %30 : vector<64x58xf32>
    %cst_17 = arith.constant 0.254829586 : f32
    %42 = vector.broadcast %cst_17 : f32 to vector<64x58xf32>
    %43 = arith.addf %41, %42 : vector<64x58xf32>
    %44 = arith.mulf %43, %30 : vector<64x58xf32>
    %cst_18 = arith.constant 0.000000e+00 : f32
    %45 = vector.broadcast %cst_18 : f32 to vector<64x58xf32>
    %46 = arith.subf %45, %24 : vector<64x58xf32>
    %47 = arith.mulf %46, %24 : vector<64x58xf32>
    %48 = math.exp %47 : vector<64x58xf32>
    %49 = arith.mulf %44, %48 : vector<64x58xf32>
    %cst_19 = arith.constant 1.000000e+00 : f32
    %50 = vector.broadcast %cst_19 : f32 to vector<64x58xf32>
    %51 = arith.subf %50, %49 : vector<64x58xf32>
    %52 = arith.mulf %23, %51 : vector<64x58xf32>
    %cst_20 = arith.constant 1.000000e+00 : f32
    %53 = vector.broadcast %cst_20 : f32 to vector<64x58xf32>
    %54 = arith.addf %53, %52 : vector<64x58xf32>
    %55 = arith.mulf %16, %54 : vector<64x58xf32>
    %c64 = arith.constant 64 : index
    %c0_21 = arith.constant 0 : index
    %56 = vector.load %arg2[%c64, %c0_21] : memref<80x128xf32, #tpu.memory_space<vmem>>, vector<8x64xf32>
    %cst_22 = arith.constant dense<0.000000e+00> : vector<8x58xf32>
    %57 = tpu.matmul %56, %55, %cst_22 {dimension_numbers = #tpu.dot_dimension_numbers<[1], [0], [0], [1], [0, 0, 1, 1], [], []>} : vector<8x64xf32>, vector<64x58xf32>, vector<8x58xf32> -> vector<8x58xf32>
    %cst_23 = arith.constant dense<0xFF800000> : vector<58xf32>
    %58 = vector.multi_reduction <maximumf>, %57, %cst_23 [0] : vector<8x58xf32> to vector<58xf32>
    %59 = vector.shape_cast %58 : vector<58xf32> to vector<1x58xf32>
    %60 = vector.broadcast %59 : vector<1x58xf32> to vector<8x58xf32>
    %61 = arith.subf %57, %60 : vector<8x58xf32>
    %62 = math.exp %61 : vector<8x58xf32>
    %cst_24 = arith.constant dense<0.000000e+00> : vector<58xf32>
    %63 = vector.multi_reduction <add>, %62, %cst_24 [0] : vector<8x58xf32> to vector<58xf32>
    %64 = vector.shape_cast %63 : vector<58xf32> to vector<1x58xf32>
    %65 = tpu.reciprocal %64 {approx = true} : vector<1x58xf32> -> vector<1x58xf32>
    %66 = vector.broadcast %65 : vector<1x58xf32> to vector<8x58xf32>
    %67 = arith.mulf %62, %66 : vector<8x58xf32>
    %c0_25 = arith.constant 0 : index
    %c64_26 = arith.constant 64 : index
    %68 = vector.load %arg2[%c0_25, %c64_26] : memref<80x128xf32, #tpu.memory_space<vmem>>, vector<64x8xf32>
    %cst_27 = arith.constant dense<0.000000e+00> : vector<64x58xf32>
    %69 = tpu.matmul %68, %67, %cst_27 {dimension_numbers = #tpu.dot_dimension_numbers<[1], [0], [0], [1], [0, 0, 1, 1], [], []>} : vector<64x8xf32>, vector<8x58xf32>, vector<64x58xf32> -> vector<64x58xf32>
    %70 = arith.mulf %69, %55 : vector<64x58xf32>
    %c72 = arith.constant 72 : index
    %c0_28 = arith.constant 0 : index
    %71 = vector.load %arg2[%c72, %c0_28] : memref<80x128xf32, #tpu.memory_space<vmem>>, vector<4x64xf32>
    %c72_29 = arith.constant 72 : index
    %c64_30 = arith.constant 64 : index
    %72 = vector.load %arg2[%c72_29, %c64_30] : memref<80x128xf32, #tpu.memory_space<vmem>>, vector<4x1xf32>
    %cst_31 = arith.constant dense<0.000000e+00> : vector<4x58xf32>
    %73 = tpu.matmul %71, %70, %cst_31 {dimension_numbers = #tpu.dot_dimension_numbers<[1], [0], [0], [1], [0, 0, 1, 1], [], []>} : vector<4x64xf32>, vector<64x58xf32>, vector<4x58xf32> -> vector<4x58xf32>
    %74 = vector.broadcast %72 : vector<4x1xf32> to vector<4x58xf32>
    %75 = arith.addf %73, %74 : vector<4x58xf32>
    %cst_32 = arith.constant 5.000000e-01 : f32
    %76 = vector.broadcast %cst_32 : f32 to vector<4x58xf32>
    %77 = arith.mulf %76, %75 : vector<4x58xf32>
    %cst_33 = arith.constant 0.707106769 : f32
    %78 = vector.broadcast %cst_33 : f32 to vector<4x58xf32>
    %79 = arith.mulf %75, %78 : vector<4x58xf32>
    %cst_34 = arith.constant 0.000000e+00 : f32
    %80 = vector.broadcast %cst_34 : f32 to vector<4x58xf32>
    %81 = arith.cmpf oge, %79, %80 : vector<4x58xf32>
    %cst_35 = arith.constant 1.000000e+00 : f32
    %cst_36 = arith.constant -1.000000e+00 : f32
    %82 = vector.broadcast %cst_35 : f32 to vector<4x58xf32>
    %83 = vector.broadcast %cst_36 : f32 to vector<4x58xf32>
    %84 = arith.select %81, %82, %83 : vector<4x58xi1>, vector<4x58xf32>
    %85 = math.absf %79 : vector<4x58xf32>
    %cst_37 = arith.constant 0.327591091 : f32
    %86 = vector.broadcast %cst_37 : f32 to vector<4x58xf32>
    %87 = arith.mulf %86, %85 : vector<4x58xf32>
    %cst_38 = arith.constant 1.000000e+00 : f32
    %88 = vector.broadcast %cst_38 : f32 to vector<4x58xf32>
    %89 = arith.addf %88, %87 : vector<4x58xf32>
    %cst_39 = arith.constant 1.000000e+00 : f32
    %90 = vector.broadcast %cst_39 : f32 to vector<4x58xf32>
    %91 = arith.divf %90, %89 : vector<4x58xf32>
    %cst_40 = arith.constant 1.06140542 : f32
    %92 = vector.broadcast %cst_40 : f32 to vector<4x58xf32>
    %93 = arith.mulf %92, %91 : vector<4x58xf32>
    %cst_41 = arith.constant -1.45315206 : f32
    %94 = vector.broadcast %cst_41 : f32 to vector<4x58xf32>
    %95 = arith.addf %93, %94 : vector<4x58xf32>
    %96 = arith.mulf %95, %91 : vector<4x58xf32>
    %cst_42 = arith.constant 1.42141378 : f32
    %97 = vector.broadcast %cst_42 : f32 to vector<4x58xf32>
    %98 = arith.addf %96, %97 : vector<4x58xf32>
    %99 = arith.mulf %98, %91 : vector<4x58xf32>
    %cst_43 = arith.constant -0.284496725 : f32
    %100 = vector.broadcast %cst_43 : f32 to vector<4x58xf32>
    %101 = arith.addf %99, %100 : vector<4x58xf32>
    %102 = arith.mulf %101, %91 : vector<4x58xf32>
    %cst_44 = arith.constant 0.254829586 : f32
    %103 = vector.broadcast %cst_44 : f32 to vector<4x58xf32>
    %104 = arith.addf %102, %103 : vector<4x58xf32>
    %105 = arith.mulf %104, %91 : vector<4x58xf32>
    %cst_45 = arith.constant 0.000000e+00 : f32
    %106 = vector.broadcast %cst_45 : f32 to vector<4x58xf32>
    %107 = arith.subf %106, %85 : vector<4x58xf32>
    %108 = arith.mulf %107, %85 : vector<4x58xf32>
    %109 = math.exp %108 : vector<4x58xf32>
    %110 = arith.mulf %105, %109 : vector<4x58xf32>
    %cst_46 = arith.constant 1.000000e+00 : f32
    %111 = vector.broadcast %cst_46 : f32 to vector<4x58xf32>
    %112 = arith.subf %111, %110 : vector<4x58xf32>
    %113 = arith.mulf %84, %112 : vector<4x58xf32>
    %cst_47 = arith.constant 1.000000e+00 : f32
    %114 = vector.broadcast %cst_47 : f32 to vector<4x58xf32>
    %115 = arith.addf %114, %113 : vector<4x58xf32>
    %116 = arith.mulf %77, %115 : vector<4x58xf32>
    %c64_48 = arith.constant 64 : index
    %c64_49 = arith.constant 64 : index
    %117 = vector.load %arg2[%c64_48, %c64_49] : memref<80x128xf32, #tpu.memory_space<vmem>>, vector<4x58xf32>
    %118 = arith.mulf %117, %116 : vector<4x58xf32>
    %cst_50 = arith.constant dense<0.000000e+00> : vector<4xf32>
    %119 = vector.multi_reduction <add>, %118, %cst_50 [1] : vector<4x58xf32> to vector<4xf32>
    %120 = vector.shape_cast %119 : vector<4xf32> to vector<4x1xf32>
    %cst_51 = arith.constant dense<0.000000e+00> : vector<1xf32>
    %121 = vector.multi_reduction <add>, %120, %cst_51 [0] : vector<4x1xf32> to vector<1xf32>
    %122 = vector.shape_cast %121 : vector<1xf32> to vector<1x1xf32>
    %c68 = arith.constant 68 : index
    %c64_52 = arith.constant 64 : index
    %123 = vector.load %arg2[%c68, %c64_52] : memref<80x128xf32, #tpu.memory_space<vmem>>, vector<4x58xf32>
    %124 = arith.mulf %123, %116 : vector<4x58xf32>
    %cst_53 = arith.constant dense<0.000000e+00> : vector<4xf32>
    %125 = vector.multi_reduction <add>, %124, %cst_53 [1] : vector<4x58xf32> to vector<4xf32>
    %126 = vector.shape_cast %125 : vector<4xf32> to vector<4x1xf32>
    %cst_54 = arith.constant dense<0.000000e+00> : vector<1xf32>
    %127 = vector.multi_reduction <add>, %126, %cst_54 [0] : vector<4x1xf32> to vector<1xf32>
    %128 = vector.shape_cast %127 : vector<1xf32> to vector<1x1xf32>
    %129 = tpu.concatenate %122, %128 in 1 : vector<1x1xf32>, vector<1x1xf32> -> vector<1x2xf32>
    %c0_55 = arith.constant 0 : index
    %c0_56 = arith.constant 0 : index
    %c0_57 = arith.constant 0 : index
    %130 = vector.load %arg3[%c0_55, %c0_56, %c0_57] : memref<1x1x2xf32, #tpu.memory_space<vmem>>, vector<1x1x2xf32>
    %131 = vector.shape_cast %130 : vector<1x1x2xf32> to vector<1x2xf32>
    %132 = vector.shape_cast %129 : vector<1x2xf32> to vector<1x1x2xf32>
    tpu.vector_store %arg3[%c0_55, %c0_56, %c0_57], %132 {strides = array<i32>} : memref<1x1x2xf32, #tpu.memory_space<vmem>>, vector<1x1x2xf32>,
    return
  }
  func.func @transform_0(%arg0: i32) -> (i32, i32, i32) {
    %c0_i32 = arith.constant 0 : i32
    %c0_i32_0 = arith.constant 0 : i32
    %c0_i32_1 = arith.constant 0 : i32
    return %arg0, %c0_i32, %c0_i32_0 : i32, i32, i32
  }
  func.func @transform_1(%arg0: i32) -> (i32, i32) {
    %c0_i32 = arith.constant 0 : i32
    %c0_i32_0 = arith.constant 0 : i32
    %c0_i32_1 = arith.constant 0 : i32
    return %c0_i32, %c0_i32_0 : i32, i32
  }
  func.func @transform_2(%arg0: i32) -> (i32, i32, i32) {
    %c0_i32 = arith.constant 0 : i32
    %c0_i32_0 = arith.constant 0 : i32
    %c0_i32_1 = arith.constant 0 : i32
    return %arg0, %c0_i32, %c0_i32_0 : i32, i32, i32
  }
}

</mosaic_0001>

<bundles_post_ra>
// kernel: lmda_forward.1
= control target key start
LH: loop header
LB: loop body
LE: loop exit
PB: predicated region body
PF: predicated region fallthrough
CT: control target
= control target key end

     0   :  { %7 = vsyncpa [#allocation3], 0  ;;  %s1658_s0 = inlined_call_operand.hbm [shape: f32[2,8,64], index: 0, kind: input, shape index: {}]   ;;  %s1659_s1 = inlined_call_operand.hbm [shape: f32[80,128], index: 1, kind: input, shape index: {}]   ;;  %s1660_s2 = inlined_call_operand.vmem [shape: f32[2,1,2], index: 2, kind: output, shape index: {}]  }
   0x1   :  { %9 = vsyncpa [#allocation3 + $0x1], 0 }
   0x2   :  { %10 = vsyncpa [#allocation5], 0  ;;  %s1200_s9 = smov 0   ;;  %s1202_s10 = smov 0  }
   0x3   :  { %s1204_s11 = smov 0   ;;  %s1206_s12 = smov 0  }
   0x4 LB: > { %s105_s15 = sshll.u32 %s1659_s1, 4  ;;  %s1222_s16 = sadd.s32 4294967295, %s1170_s12   ;;  %s1170_s12 = sphi %s1206_s12, %s1685_s12   ;;  %s1166_s11 = sphi %s1204_s11, %s1684_s11   ;;  %s1162_s10 = sphi %s1202_s10, %s1683_s10   ;;  %s1158_s9 = sphi %s1200_s9, %s1682_s9   ;;  %s106_s15 = int_to_ptr.hbm [resolvable:$true] %s105_s15 }
   0x5   : > { %p929_p0 = scmp.ge.s32.totalorder %s1170_s12, 1  ;;  %p37_p1 = scmp.eq.s32.totalorder %s1222_s16, 0 }
   0x6   : > { %p94_p2 = scmp.lt.s32.totalorder %s1170_s12, 3  ;;  %s1172_s18 = smov [#allocation4]  }
   0x7   : > { %s107_s19 = sshll.u32 %s1172_s18, 4  ;;  %s1173_s20 = smov 128   ;;  %s108_s19 = int_to_ptr.vmem [resolvable:$true] %s107_s19 }
   0x8   : > { %p1227_p3 = pnand %p929_p0, %p94_p2  ;;  %s1174_s21 = smov 8  }
   0x9   : > { %s1236_s22 = sadd.s32 1, %s1170_s12   ;;  %s23_s24 = sadd.s32 1, %s1166_s11 }
   0xa   : > { %p971_p4 = pneg %p1227_p3  ;;  %s20_s23 = ssub.s32 %s1170_s12, %s1236_s22 }
   0xb   : > { %p21_p6 = scmp.eq.s32.totalorder %s20_s23, 0  ;;  %p30_p7 = scmp.ne.s32.totalorder %s1166_s11, %s1162_s10 }
   0xc   : > { %p972_p5 = pnand %p971_p4, %p37_p1  ;;  %p31_p8 = scmp.eq.s32.totalorder %s1170_s12, 0 }
   0xd   : > { %p36_p9 = scmp.ne.s32.totalorder %s1162_s10, %s1158_s9  ;;  %p980_p12 = scmp.lt.s32.totalorder %s1170_s12, 2 }
   0xe   : > { %974 = dma.hbm_to_vmem [thread:$0]  (!%p972_p5), %s106_s15, 1280, %s108_s19, [#allocation5], %s1173_s20, %s1173_s20, %s1174_s21  }
   0xf   : > { %s1246_s25 = scalar_select %p21_p6, %s1166_s11, %s23_s24  }
  0x10   : > { %p32_p10 = por %p31_p8, %p30_p7  ;;  %p1250_p11 = por %p37_p1, %p36_p9 }
  0x11   : > { %s121_s27 = sand.u32 1, %s1166_s11   ;;  %s933_s29 = sshll.u32 %s1170_s12, 3 }
  0x12   : > { %s932_s28 = sshll.u32 %s121_s27, 3  ;;  %s129_s4 = scalar_lea.hbm %s1658_s0, %s933_s29 }
  0x13   : > { %s125_s5 = scalar_lea.vmem [#allocation2], %s932_s28  ;;  %s131_s7 = sshll.u32 %s129_s4, 4  ;;  %s132_s7 = int_to_ptr.hbm [resolvable:$true] %s131_s7 }
  0x14   : > { %s133_s6 = sshll.u32 %s125_s5, 4  ;;  %p1260_p13 = pnand %p980_p12, %p32_p10  ;;  %s134_s6 = int_to_ptr.vmem [resolvable:$true] %s133_s6 }
  0x15   : > { %s122_s9 = scalar_lea.sflag [#allocation3], %s121_s27  ;;  %s1102_s13 = sshra.s32 %s132_s7, 4  ;;  %s1103_s13 = int_to_ptr.hbm [resolvable:$true] %s1102_s13 }
  0x16   : > { %s1104_s14 = scalar_lea.hbm %s1103_s13, 8  ;;  %p1106_p2 = pneg %p1260_p13 }
  0x17   : > { %p1105_p0 = scmp.ne.s32.totalorder %s1103_s13, %s1104_s14  ;;  %s1109_s18 = scalar_lea.hbm %s1658_s0, 16 }
  0x18   : > { %p1110_p6 = scmp.lt.s32.totalorder %s1103_s13, %s1658_s0  ;;  %p1111_p7 = scmp.lt.s32.totalorder %s1109_s18, %s1104_s14 }
  0x19   : > { %p1107_p4 = pnand %p1106_p2, %p1105_p0 }
  0x1a   : > { %p1112_p8 = por %p1111_p7, %p1110_p6 }
  0x1b   : > { %p1108_p5 = pneg %p1107_p4 }
  0x1d   : > { %p1113_p9 = pnand %p1112_p8, %p1108_p5 }
  0x1f   : > { %1116 = shalt.err (!%p1113_p9)
}
  0x20   : > { %978 = dma.hbm_to_vmem [thread:$0]  (!%p1260_p13), %s132_s7, 128, %s134_s6, %s122_s9  }
  0x21   : > { %142 = sbr.rel (%p1227_p3) target bundleno = 1311 (0x51f), region = 28  ;;  %s144_s21 = sand.u32 (!%p1227_p3), 1, %s1162_s10  }
  0x22   : > { %s935_s23 = sshll.u32 (!%p1227_p3), %s144_s21, 3  ;;  %s145_s24 = scalar_lea.sflag (!%p1227_p3), [#allocation3], %s144_s21 }
  0x23   : > { %s148_s27 = scalar_lea.vmem (!%p1227_p3), [#allocation2], %s935_s23 }
  0x26   : > { %1149 = dma.done.wait (%p1250_p11), %s145_s24, 128  }
  0x27   : > { %1151 = vsyncadd (%p1250_p11), %s145_s24, 4294967168 }
  0x28   : > { %1153 = dma.done.wait (%p37_p1), [#allocation5], 1280  }
  0x29   : > { %1155 = vsyncadd (%p37_p1), [#allocation5], 4294966016  ;;  %v176_v0 = vld [vmem:[%s148_s27] sm:$0xff]  ;;  %s1175_s17 = smov 122   ;;  %s1176_s28 = smov 124   ;;  %v1181_v2 = vmov 56  }
  0x2a   : > { %193 = vrot.lane.b32.xlu0 %v176_v0, %s1175_s17  ;;  %187 = vrot.lane.b32.xlu1 %v176_v0, %s1176_s28  ;;  %s1177_s29 = smov 126   ;;  %s1178_s30 = smov 123   ;;  %v202_v1 = vld [vmem:[#allocation4 + $0x30] sm:$0xff]  ;;  %v201_v3 = vld [vmem:[#allocation4 + $0x28] sm:$0xff]  ;;  %v200_v4 = vld [vmem:[#allocation4 + $0x20] sm:$0xff]  ;;  %vm244_vm0 = vcmask 457728  }
  0x2b   : > { %181 = vrot.lane.b32.xlu2 %v176_v0, %s1177_s29  ;;  %s1179_s3 = smov 125   ;;  %s1180_s4 = smov 127   ;;  %1028 = vset.pattern.permute.xlu1 %v1181_v2  ;;  %v203_v7 = vld [vmem:[#allocation4 + $0x38] sm:$0xff]  ;;  %v197_v10 = vld [vmem:[#allocation4 + $0x8] sm:$0xff]  ;;  %v198_v13 = vld [vmem:[#allocation4 + $0x10] sm:$0xff]  ;;  %v1183_v61 = vmov -1.0  }
  0x2c   : > { %1029 = vset.pattern.permute.xlu2 %v1181_v2  ;;  %1027 = vset.pattern.permute.xlu0 %v1181_v2  ;;  %v199_v9 = vld [vmem:[#allocation4 + $0x18] sm:$0xff]  ;;  %v196_v14 = vld [vmem:[#allocation4] sm:$0xff]  ;;  %s1182_s26 = smov 64   ;;  %p173_p1 = scmp.lt.s32.totalorder %s1222_s16, 1 }
  0x2e   : > { %s1687_s16 = smov (!%p173_p1, %s1222_s16), 1 }
  0x2f   : > { %s175_s7 = scalar_lea.vmem %s1660_s2, %s1687_s16 }
  0x32   : > { %190 = vrot.lane.b32.xlu0 %v176_v0, %s1178_s30  ;;  %184 = vrot.lane.b32.xlu1 %v176_v0, %s1179_s3 }
  0x33   : > { %178 = vrot.lane.b32.xlu2 %v176_v0, %s1180_s4 }
  0x3a   : > { %236 = vperm.xlu1 %1028, %v202_v1   ;;  %241 = vperm.xlu0 %1027, %v203_v7  }
  0x3b   : > { %231 = vperm.xlu2 %1029, %v201_v3  }
  0x42   : > { %226 = vperm.xlu1 %1028, %v200_v4   ;;  %216 = vperm.xlu0 %1027, %v198_v13  }
  0x43   : > { %221 = vperm.xlu2 %1029, %v199_v9  }
  0x4a   : > { %211 = vperm.xlu1 %1028, %v197_v10   ;;  %667 = vrot.lane.b32.xlu0 %v196_v14, %s1182_s26 }
  0x4b   : > { %206 = vperm.xlu2 %1029, %v196_v14  }
  0x52   : > { %669 = vrot.lane.b32.xlu1 %v197_v10, %s1182_s26  ;;  %673 = vrot.lane.b32.xlu0 %v199_v9, %s1182_s26 }
  0x53   : > { %671 = vrot.lane.b32.xlu2 %v198_v13, %s1182_s26 }
  0x5a   : > { %679 = vrot.lane.b32.xlu1 %v202_v1, %s1182_s26  ;;  %681 = vrot.lane.b32.xlu0 %v203_v7, %s1182_s26 }
  0x5b   : > { %675 = vrot.lane.b32.xlu2 %v200_v4, %s1182_s26 }
  0x62   : > { %677 = vrot.lane.b32.xlu1 %v201_v3, %s1182_s26 }
  0x85   : > { %v182_v8 = vpop.permute.xlu2 %181 }
  0x8d   : > { %v179_v15 = vpop.permute.xlu2 %178 }
  0x95   : > { %v232_v16 = vpop.permute.xlu2 %231 }
  0x9c   : > { %v194_v5 = vpop.permute.xlu0 %193  ;;  %v188_v6 = vpop.permute.xlu1 %187 }
  0x9d   : > { %270 = vmatpush.msra.mxu0 %v194_v5  ;;  %957 = vmatpush.msra.mxu1 %v194_v5  ;;  %v1291_v18 = vpop.permute.xlu2 %221 }
  0xa4   : > { %v191_v11 = vpop.permute.xlu0 %190  ;;  %v185_v12 = vpop.permute.xlu1 %184 }
  0xa5   : > { %271 = vmatpush.msra.mxu0 %v191_v11  ;;  %958 = vmatpush.msra.mxu1 %v191_v11  ;;  %v207_v20 = vpop.permute.xlu2 %206 }
  0xa7   : > { %272 = vmatpush.msra.mxu0 %v188_v6  ;;  %959 = vmatpush.msra.mxu1 %v188_v6 }
  0xa9   : > { %273 = vmatpush.msra.mxu0 %v185_v12  ;;  %960 = vmatpush.msra.mxu1 %v185_v12 }
  0xab   : > { %274 = vmatpush.msra.mxu0 %v182_v8  ;;  %961 = vmatpush.msra.mxu1 %v182_v8 }
  0xac   : > { %v237_v17 = vpop.permute.xlu1 %236  ;;  %v242_v29 = vpop.permute.xlu0 %241 }
  0xad   : > { %275 = vmatpush.msra.mxu0 %v179_v15  ;;  %962 = vmatpush.msra.mxu1 %v179_v15 }
  0xaf   : > { %276 = vmatpush.msra.mxu0 %v176_v0  ;;  %963 = vmatpush.msra.mxu1 %v176_v0 }
  0xb0   : > { %937 = vmatmul.msk.f32.vlgmr.msra.gmra.mxu0 %vm244_vm0, %v196_v14  ;;  %942 = vmatmul.msk.f32.vlgmr.msra.gmra.mxu1 %vm244_vm0, %v201_v3 }
  0xb4   : > { %v1295_v19 = vpop.permute.xlu1 %226  ;;  %v217_v44 = vpop.permute.xlu0 %216 }
  0xb8   : > { %938 = vmatmul.msk.f32.gmra.mxu0 %vm244_vm0, %v197_v10  ;;  %943 = vmatmul.msk.f32.gmra.mxu1 %vm244_vm0, %v202_v1 }
  0xbc   : > { %v212_v31 = vpop.permute.xlu1 %211 }
  0xc0   : > { %939 = vmatmul.msk.f32.gmra.mxu0 %vm244_vm0, %v198_v13  ;;  %944 = vmatmul.msk.f32.gmra.mxu1 %vm244_vm0, %v203_v7 }
  0xc8   : > { %940 = vmatmul.msk.f32.gmra.mxu0 %vm244_vm0, %v199_v9 }
  0xd0   : > { %941 = vmatmul.msk.f32.gmra.mxu0 %vm244_vm0, %v200_v4 }
 0x12d   : > { %v278_v21 = vpop.f32.mrf.mxu0  ;;  %v293_v22 = vpop.f32.mrf.mxu1 }
 0x12e   : > { %v1297_v23 = vadd.f32 %v278_v21, %v207_v20  ;;  %v294_v24 = vadd.f32 %v293_v22, %v232_v16 }
 0x130   : > { %v1300_v25 = vmul.f32 0.70710677, %v1297_v23  ;;  %v315_v26 = vmul.f32 0.70710677, %v294_v24  ;;  %v1327_v59 = vmul.f32 0.5, %v294_v24 }
 0x132   : > { %v1303_v27 = vand.u32 2147483647, %v1300_v25  ;;  %v339_v28 = vand.u32 2147483647, %v315_v26  ;;  %vm323_vm1 = vcmp.ge.f32.partialorder %v315_v26, 0.0 }
 0x133   : > { %v1331_v62 = vsel %vm323_vm1, 1.0, %v1183_v61 }
 0x134   : > { %v347_v30 = vmul.f32 0.3275911, %v339_v28  ;;  %v342_v32 = vmul.f32 0.3275911, %v1303_v27  ;;  %v555_v39 = vsub.f32 0.0, %v339_v28 }
 0x135   : > { %v281_v33 = vpop.f32.mrf.mxu0  ;;  %v296_v34 = vpop.f32.mrf.mxu1 }
 0x136   : > { %v1306_v35 = vadd.f32 1.0, %v347_v30  ;;  %v1308_v36 = vadd.f32 %v281_v33, %v212_v31  ;;  %v297_v37 = vadd.f32 %v296_v34, %v237_v17  ;;  %v1310_v38 = vadd.f32 1.0, %v342_v32 }
 0x137   : > { %v563_v45 = vmul.f32 %v555_v39, %v339_v28 }
 0x138   : > { %v1313_v40 = vmul.f32 0.70710677, %v1308_v36  ;;  %1032 = vrcp.f32 %v1306_v35  ;;  %v316_v41 = vmul.f32 0.70710677, %v297_v37  ;;  %v444_v58 = vand.u32 2147483648, %v1306_v35 }
 0x139   : > { %1034 = vrcp.f32 %v1310_v38  ;;  %v576_v56 = vmul.f32 1.442695, %v563_v45  ;;  %v1341_v4 = vmul.f32 0.5, %v297_v37  ;;  %v442_v5 = vand.u32 2147483647, %v1306_v35 }
 0x13a   : > { %v335_v42 = vand.u32 2147483647, %v1313_v40  ;;  %v340_v43 = vand.u32 2147483647, %v316_v41  ;;  %vm324_vm2 = vcmp.ge.f32.partialorder %v316_v41, 0.0  ;;  %vm438_vm3 = vweird.f32 %v1306_v35 }
 0x13b   : > { %v445_v9 = vor.u32 1.1754944e-38, %v444_v58  ;;  %v1355_v13 = vsel %vm324_vm2, 1.0, %v1183_v61  ;;  %vm1370_vm5 = vcmp.eq.f32.partialorder %v442_v5, 8.507059e+37 }
 0x13c   : > { %v343_v46 = vmul.f32 0.3275911, %v335_v42  ;;  %v348_v49 = vmul.f32 0.3275911, %v340_v43  ;;  %v556_v50 = vsub.f32 0.0, %v340_v43  ;;  %v551_v3 = vsub.f32 0.0, %v335_v42 }
 0x13d   : > { %v284_v47 = vpop.f32.mrf.mxu0  ;;  %v299_v48 = vpop.f32.mrf.mxu1 }
 0x13e   : > { %v300_v51 = vadd.f32 %v299_v48, %v242_v29  ;;  %v1318_v52 = vadd.f32 %v284_v47, %v217_v44  ;;  %v1320_v53 = vpop.eup %1032  ;;  %v1322_v54 = vadd.f32 1.0, %v343_v46  ;;  %v1324_v55 = vadd.f32 1.0, %v348_v49 }
 0x13f   : > { %v564_v60 = vmul.f32 %v556_v50, %v340_v43  ;;  %v1333_v63 = vpop.eup %1034  ;;  %v434_v0 = vmul.f32 %v1320_v53, %v1306_v35  ;;  %v1359_v21 = vmul.f32 %v551_v3, %v335_v42  ;;  %vm439_vm10 = vweird.f32 %v1320_v53 }
 0x140   : > { %v317_v57 = vmul.f32 0.70710677, %v300_v51  ;;  %1036 = vrcp.f32 %v1324_v55  ;;  %v1338_v2 = vmul.f32 0.70710677, %v1318_v52  ;;  %v1348_v10 = vmul.f32 %v1333_v63, %v1310_v38  ;;  %vm440_vm11 = vmor %vm438_vm3, %vm439_vm10 }
 0x141   : > { %1038 = vrcp.f32 %v1322_v54  ;;  %v578_v11 = vmul.f32 1.442695, %v564_v60  ;;  %v435_v14 = vsub.f32 1.0, %v434_v0  ;;  %v457_v24 = vand.u32 2147483647, %v1324_v55 }
 0x142   : > { %v341_v1 = vand.u32 2147483647, %v317_v57  ;;  %1040 = vpow2.f32 %v576_v56  ;;  %v336_v7 = vand.u32 2147483647, %v1338_v2  ;;  %vm325_vm4 = vcmp.ge.f32.partialorder %v317_v57, 0.0 }
 0x143   : > { %v1366_v26 = vmul.f32 0.5, %v300_v51  ;;  %v459_v28 = vand.u32 2147483648, %v1324_v55  ;;  %v360_v31 = vsub.f32 1.0, %v1348_v10  ;;  %v1384_v41 = vsel %vm325_vm4, 1.0, %v1183_v61 }
 0x144   : > { %v349_v6 = vmul.f32 0.3275911, %v341_v1  ;;  %v557_v16 = vsub.f32 0.0, %v341_v1  ;;  %v344_v17 = vmul.f32 0.3275911, %v336_v7  ;;  %v436_v42 = vmul.f32 %v1320_v53, %v435_v14 }
 0x145   : > { %v287_v8 = vpop.f32.mrf.mxu0  ;;  %v552_v43 = vsub.f32 0.0, %v336_v7  ;;  %vm453_vm6 = vweird.f32 %v1324_v55  ;;  %vm1388_vm7 = vcmp.eq.f32.partialorder %v457_v24, 8.507059e+37  ;;  %v460_v49 = vor.u32 1.1754944e-38, %v459_v28 }
 0x146   : > { %v1351_v12 = vadd.f32 %v287_v8, %v1291_v18  ;;  %v1357_v15 = vadd.f32 1.0, %v349_v6  ;;  %v1037_v20 = vpop.eup %1036  ;;  %v1377_v32 = vadd.f32 1.0, %v344_v17  ;;  %v565_v39 = vmul.f32 %v557_v16, %v341_v1 }
 0x147   : > { %v449_v18 = vmul.f32 %v1037_v20, %v1324_v55  ;;  %v1374_v30 = vpop.eup %1038  ;;  %vm454_vm8 = vweird.f32 %v1037_v20  ;;  %v437_v0 = vadd.f32 %v1320_v53, %v436_v42  ;;  %v560_v5 = vmul.f32 %v552_v43, %v336_v7 }
 0x148   : > { %v1362_v22 = vmul.f32 0.70710677, %v1351_v12  ;;  %1042 = vrcp.f32 %v1357_v15  ;;  %v1380_v34 = vpop.eup %1040  ;;  %v1394_v46 = vmul.f32 %v1374_v30, %v1322_v54  ;;  %v580_v57 = vmul.f32 1.442695, %v565_v39  ;;  %vm1402_vm9 = vmor %vm453_vm6, %vm454_vm8 }
 0x149   : > { %1044 = vpow2.f32 %v578_v11  ;;  %v450_v37 = vsub.f32 1.0, %v449_v18  ;;  %v474_v8 = vand.u32 2147483648, %v1357_v15  ;;  %v441_v14 = vsel %vm440_vm11, %v1320_v53, %v437_v0 }
 0x14a   : > { %v337_v33 = vand.u32 2147483647, %v1362_v22  ;;  %1046 = vrcp.f32 %v1377_v32  ;;  %v1428_v35 = vsel %vm1370_vm5, %v445_v9, %v441_v14  ;;  %v375_v24 = vsub.f32 1.0, %v1394_v46 }
 0x14b   : > { %v451_v48 = vmul.f32 %v1037_v20, %v450_v37  ;;  %vm468_vm12 = vweird.f32 %v1357_v15  ;;  %v570_v53 = vmul.f32 1.442695, %v560_v5  ;;  %v483_v37 = vmul.f32 1.0614054, %v1428_v35 }
 0x14c   : > { %v345_v44 = vmul.f32 0.3275911, %v337_v33  ;;  %v553_v51 = vsub.f32 0.0, %v337_v33  ;;  %v475_v45 = vor.u32 1.1754944e-38, %v474_v8 }
 0x14d   : > { %v290_v47 = vpop.f32.mrf.mxu0  ;;  %v452_v58 = vadd.f32 %v1037_v20, %v451_v48 }
 0x14e   : > { %v1397_v50 = vadd.f32 1.0, %v345_v44  ;;  %v1400_v56 = vadd.f32 %v290_v47, %v1295_v19  ;;  %v1043_v55 = vpop.eup %1042  ;;  %v472_v19 = vand.u32 2147483647, %v1357_v15  ;;  %v561_v17 = vmul.f32 %v553_v51, %v337_v33 }
 0x14f   : > { %v1408_v1 = vpop.eup %1044  ;;  %v464_v3 = vmul.f32 %v1043_v55, %v1357_v15  ;;  %v456_v11 = vsel %vm1402_vm9, %v1037_v20, %v452_v58  ;;  %vm469_vm13 = vweird.f32 %v1043_v55  ;;  %v491_v47 = vadd.f32 -1.4531521, %v483_v37 }
 0x150   : > { %1048 = vrcp.f32 %v1397_v50  ;;  %v1416_v6 = vmul.f32 0.70710677, %v1400_v56  ;;  %v1424_v7 = vsel %vm1388_vm7, %v460_v49, %v456_v11  ;;  %v1434_v28 = vpop.eup %1046  ;;  %vm1437_vm14 = vcmp.eq.f32.partialorder %v472_v19, 8.507059e+37  ;;  %vm470_vm15 = vmor %vm468_vm12, %vm469_vm13 }
 0x151   : > { %v465_v16 = vsub.f32 1.0, %v464_v3  ;;  %v484_v20 = vmul.f32 1.0614054, %v1424_v7  ;;  %1050 = vpow2.f32 %v580_v57  ;;  %v572_v43 = vmul.f32 1.442695, %v561_v17 }
 0x152   : > { %v338_v18 = vand.u32 2147483647, %v1416_v6  ;;  %v389_v48 = vmul.f32 %v1434_v28, %v1377_v32  ;;  %1052 = vpow2.f32 %v570_v53  ;;  %v499_v0 = vmul.f32 %v491_v47, %v1428_v35 }
 0x153   : > { %v466_v33 = vmul.f32 %v1043_v55, %v465_v16  ;;  %v492_v29 = vadd.f32 -1.4531521, %v484_v20  ;;  %v412_v19 = vand.u32 2147483647, %v1397_v50  ;;  %v414_v37 = vand.u32 2147483648, %v1397_v50 }
 0x154   : > { %v346_v39 = vmul.f32 0.3275911, %v338_v18  ;;  %v554_v58 = vsub.f32 0.0, %v338_v18  ;;  %v507_v11 = vadd.f32 1.4214138, %v499_v0  ;;  %v390_v16 = vsub.f32 1.0, %v389_v48 }
 0x155   : > { %v467_v44 = vadd.f32 %v1043_v55, %v466_v33  ;;  %v500_v57 = vmul.f32 %v492_v29, %v1424_v7  ;;  %vm408_vm1 = vweird.f32 %v1397_v50  ;;  %vm1466_vm2 = vcmp.eq.f32.partialorder %v412_v19, 8.507059e+37 }
 0x156   : > { %v1049_v42 = vpop.eup %1048  ;;  %v1444_v51 = vadd.f32 1.0, %v346_v39  ;;  %v515_v33 = vmul.f32 %v507_v11, %v1428_v35  ;;  %v1463_v39 = vmul.f32 %v554_v58, %v338_v18  ;;  %vm394_vm5 = vweird.f32 %v1434_v28 }
 0x157   : > { %v404_v49 = vmul.f32 %v1049_v42, %v1397_v50  ;;  %v471_v60 = vsel %vm470_vm15, %v1043_v55, %v467_v44  ;;  %v508_v8 = vadd.f32 1.4214138, %v500_v57  ;;  %v1457_v14 = vpop.eup %1050  ;;  %vm409_vm0 = vweird.f32 %v1049_v42 }
 0x158   : > { %1054 = vrcp.f32 %v1444_v51  ;;  %v1453_v5 = vsel %vm1437_vm14, %v475_v45, %v471_v60  ;;  %v427_v55 = vand.u32 2147483647, %v1444_v51  ;;  %v523_v47 = vadd.f32 -0.28449672, %v515_v33  ;;  %vm410_vm4 = vmor %vm408_vm1, %vm409_vm0 }
 0x159   : > { %v405_v3 = vsub.f32 1.0, %v404_v49  ;;  %1056 = vpow2.f32 %v572_v43  ;;  %v485_v15 = vmul.f32 1.0614054, %v1453_v5  ;;  %v516_v53 = vmul.f32 %v508_v8, %v1424_v7  ;;  %v1470_v43 = vpop.eup %1052 }
 0x15a   : > { %vm423_vm3 = vweird.f32 %v1444_v51  ;;  %v429_v48 = vand.u32 2147483648, %v1444_v51  ;;  %v415_v57 = vor.u32 1.1754944e-38, %v414_v37  ;;  %v391_v50 = vmul.f32 %v1434_v28, %v390_v16 }
 0x15b   : > { %v406_v17 = vmul.f32 %v1049_v42, %v405_v3  ;;  %v493_v20 = vadd.f32 -1.4531521, %v485_v15  ;;  %v524_v45 = vadd.f32 -0.28449672, %v516_v53  ;;  %v531_v19 = vmul.f32 %v523_v47, %v1428_v35 }
 0x15c   : > { %vm1483_vm6 = vcmp.eq.f32.partialorder %v427_v55, 8.507059e+37  ;;  %v392_v8 = vadd.f32 %v1434_v28, %v391_v50  ;;  %vm393_vm7 = vweird.f32 %v1377_v32  ;;  %v397_v11 = vand.u32 2147483647, %v1377_v32 }
 0x15d   : > { %v407_v9 = vadd.f32 %v1049_v42, %v406_v17  ;;  %v501_v44 = vmul.f32 %v493_v20, %v1453_v5  ;;  %v532_v3 = vmul.f32 %v524_v45, %v1424_v7  ;;  %v539_v53 = vadd.f32 0.2548296, %v531_v19  ;;  %vm1497_vm8 = vmor %vm393_vm7, %vm394_vm5 }
 0x15e   : > { %v1055_v18 = vpop.eup %1054  ;;  %v396_v37 = vsel %vm1497_vm8, %v1434_v28, %v392_v8  ;;  %vm398_vm10 = vcmp.eq.f32.partialorder %v397_v11, 8.507059e+37  ;;  %v376_v50 = vmul.f32 %v1374_v30, %v375_v24  ;;  %vm379_vm12 = vweird.f32 %v1374_v30 }
 0x15f   : > { %v411_v49 = vsel %vm410_vm4, %v1049_v42, %v407_v9  ;;  %v1478_v58 = vpop.eup %1056  ;;  %v419_v60 = vmul.f32 %v1055_v18, %v1444_v51  ;;  %v509_v0 = vadd.f32 1.4214138, %v501_v44  ;;  %v540_v20 = vadd.f32 0.2548296, %v532_v3 }
 0x160   : > { %v1489_v42 = vsel %vm1466_vm2, %v415_v57, %v411_v49  ;;  %vm424_vm9 = vweird.f32 %v1055_v18  ;;  %v399_v9 = vand.u32 2147483648, %v1377_v32  ;;  %v547_v45 = vmul.f32 %v539_v53, %v1428_v35 }
 0x161   : > { %v420_v16 = vsub.f32 1.0, %v419_v60  ;;  %v517_v17 = vmul.f32 %v509_v0, %v1453_v5  ;;  %v481_v33 = vmul.f32 1.0614054, %v1489_v42  ;;  %v548_v44 = vmul.f32 %v540_v20, %v1424_v7  ;;  %vm425_vm11 = vmor %vm423_vm3, %vm424_vm9 }
 0x162   : > { %v400_v57 = vor.u32 1.1754944e-38, %v399_v9  ;;  %v587_v28 = vmul.f32 %v1380_v34, %v547_v45  ;;  %v430_v7 = vor.u32 1.1754944e-38, %v429_v48  ;;  %v377_v46 = vadd.f32 %v1374_v30, %v376_v50 }
 0x163   : > { %v525_v29 = vadd.f32 -0.28449672, %v517_v17  ;;  %v421_v47 = vmul.f32 %v1055_v18, %v420_v16  ;;  %v489_v49 = vadd.f32 -1.4531521, %v481_v33  ;;  %v588_v0 = vmul.f32 %v1408_v1, %v548_v44 }
 0x164   : > { %v1518_v3 = vsel %vm398_vm10, %v400_v57, %v396_v37  ;;  %v595_v1 = vsub.f32 1.0, %v587_v28  ;;  %vm378_vm13 = vweird.f32 %v1322_v54  ;;  %v382_v15 = vand.u32 2147483647, %v1322_v54 }
 0x165   : > { %v533_v60 = vmul.f32 %v525_v29, %v1453_v5  ;;  %v422_v32 = vadd.f32 %v1055_v18, %v421_v47  ;;  %v497_v35 = vmul.f32 %v489_v49, %v1489_v42  ;;  %v596_v24 = vsub.f32 1.0, %v588_v0  ;;  %vm1532_vm14 = vmor %vm378_vm13, %vm379_vm12 }
 0x166   : > { %v480_v51 = vmul.f32 1.0614054, %v1518_v3  ;;  %v384_v55 = vand.u32 2147483648, %v1322_v54  ;;  %v574_v33 = vmul.f32 1.442695, %v1463_v39  ;;  %v381_v37 = vsel %vm1532_vm14, %v1374_v30, %v377_v46 }
 0x167   : > { %v541_v19 = vadd.f32 0.2548296, %v533_v60  ;;  %v426_v8 = vsel %vm425_vm11, %v1055_v18, %v422_v32  ;;  %v505_v11 = vadd.f32 1.4214138, %v497_v35  ;;  %v604_v16 = vmul.f32 %v596_v24, %v1355_v13 }
 0x168   : > { %v1524_v34 = vsel %vm1483_vm6, %v430_v7, %v426_v8  ;;  %v488_v20 = vadd.f32 -1.4531521, %v480_v51  ;;  %v603_v9 = vmul.f32 %v595_v1, %v1331_v62  ;;  %v385_v45 = vor.u32 1.1754944e-38, %v384_v55 }
 0x169   : > { %v549_v48 = vmul.f32 %v541_v19, %v1453_v5  ;;  %v482_v17 = vmul.f32 1.0614054, %v1524_v34  ;;  %v513_v18 = vmul.f32 %v505_v11, %v1489_v42  ;;  %v612_v49 = vadd.f32 1.0, %v604_v16 }
 0x16a   : > { %v496_v44 = vmul.f32 %v488_v20, %v1518_v3  ;;  %vm383_vm15 = vcmp.eq.f32.partialorder %v382_v15, 8.507059e+37  ;;  %v361_v30 = vmul.f32 %v1333_v63, %v360_v31  ;;  %vm363_vm0 = vweird.f32 %v1310_v38 }
 0x16b   : > { %v589_v5 = vmul.f32 %v1457_v14, %v549_v48  ;;  %v490_v13 = vadd.f32 -1.4531521, %v482_v17  ;;  %v521_v29 = vadd.f32 -0.28449672, %v513_v18  ;;  %v1547_v14 = vsel %vm383_vm15, %v385_v45, %v381_v37 }
 0x16c   : > { %v504_v39 = vadd.f32 1.4214138, %v496_v44  ;;  %v479_v60 = vmul.f32 1.0614054, %v1547_v14  ;;  %v362_v32 = vadd.f32 %v1333_v63, %v361_v30  ;;  %vm364_vm1 = vweird.f32 %v1333_v63 }
 0x16d   : > { %v597_v47 = vsub.f32 1.0, %v589_v5  ;;  %v498_v57 = vmul.f32 %v490_v13, %v1524_v34  ;;  %v529_v54 = vmul.f32 %v521_v29, %v1489_v42  ;;  %v367_v31 = vand.u32 2147483647, %v1310_v38  ;;  %vm1561_vm2 = vmor %vm363_vm0, %vm364_vm1 }
 0x16e   : > { %v512_v28 = vmul.f32 %v504_v39, %v1518_v3  ;;  %v487_v10 = vadd.f32 -1.4531521, %v479_v60  ;;  %v611_v46 = vadd.f32 1.0, %v603_v9  ;;  %v369_v8 = vand.u32 2147483648, %v1310_v38 }
 0x16f   : > { %v605_v62 = vmul.f32 %v597_v47, %v1384_v41  ;;  %v506_v50 = vadd.f32 1.4214138, %v498_v57  ;;  %v537_v0 = vadd.f32 0.2548296, %v529_v54  ;;  %v366_v48 = vsel %vm1561_vm2, %v1333_v63, %v362_v32 }
 0x170   : > { %v520_v19 = vadd.f32 -0.28449672, %v512_v28  ;;  %v495_v51 = vmul.f32 %v487_v10, %v1547_v14  ;;  %1058 = vpow2.f32 %v574_v33  ;;  %v370_v17 = vor.u32 1.1754944e-38, %v369_v8 }
 0x171   : > { %v613_v7 = vadd.f32 1.0, %v605_v62  ;;  %v514_v35 = vmul.f32 %v506_v50, %v1524_v34  ;;  %v545_v41 = vmul.f32 %v537_v0, %v1489_v42  ;;  %v1574_v42 = vmul.f32 %v612_v49, %v1341_v4 }
 0x172   : > { %v528_v16 = vmul.f32 %v520_v19, %v1518_v3  ;;  %v503_v18 = vadd.f32 1.4214138, %v495_v51  ;;  %vm368_vm3 = vcmp.eq.f32.partialorder %v367_v31, 8.507059e+37  ;;  %v550_v20 = vsub.f32 0.0, %v1303_v27 }
 0x173   : > { %v1567_v1 = vmul.f32 %v613_v7, %v1366_v26  ;;  %v522_v11 = vadd.f32 -0.28449672, %v514_v35  ;;  %v585_v26 = vmul.f32 %v1478_v58, %v545_v41  ;;  %v568_v53 = vmul.f32 1.442695, %v1359_v21 }
 0x174   : > { %v536_v63 = vadd.f32 0.2548296, %v528_v16  ;;  %v371_v15 = vsel %vm368_vm3, %v370_v17, %v366_v48  ;;  %v1584_v4 = vmul.f32 %v611_v46, %v1327_v59  ;;  %v511_v33 = vmul.f32 %v503_v18, %v1547_v14 }
 0x175   : > { %635 = vmatpush.msrb.mxu1 %v1567_v1  ;;  %v530_v38 = vmul.f32 %v522_v11, %v1524_v34  ;;  %v478_v5 = vmul.f32 1.0614054, %v371_v15  ;;  %vm321_vm4 = vcmp.ge.f32.partialorder %v1362_v22, 0.0  ;;  %v593_v21 = vsub.f32 1.0, %v585_v26 }
 0x176   : > { %v544_v58 = vmul.f32 %v536_v63, %v1518_v3  ;;  %v519_v37 = vadd.f32 -0.28449672, %v511_v33  ;;  %v1059_v29 = vpop.eup %1058  ;;  %v558_v44 = vmul.f32 %v550_v20, %v1303_v27  ;;  %1060 = vpow2.f32 %v568_v53  ;;  %v622_v63 = vld [vmem:[#allocation4 + $0x40] sm:$0xff] }
 0x177   : > { %636 = vmatpush.msrb.mxu1 %v1574_v42  ;;  %v538_v55 = vadd.f32 0.2548296, %v530_v38  ;;  %v486_v9 = vadd.f32 -1.4531521, %v478_v5  ;;  %vm320_vm5 = vcmp.ge.f32.partialorder %v1338_v2, 0.0  ;;  %vm322_vm6 = vcmp.ge.f32.partialorder %v1416_v6, 0.0 }
 0x178   : > { %v584_v59 = vmul.f32 %v1470_v43, %v544_v58  ;;  %v527_v3 = vmul.f32 %v519_v37, %v1547_v14  ;;  %v566_v30 = vmul.f32 1.442695, %v558_v44  ;;  %v330_v2 = vsel %vm322_vm6, 1.0, %v1183_v61 }
 0x179   : > { %637 = vmatpush.msrb.mxu1 %v1584_v4  ;;  %v546_v13 = vmul.f32 %v538_v55, %v1524_v34  ;;  %v494_v47 = vmul.f32 %v486_v9, %v371_v15  ;;  %v329_v34 = vsel %vm321_vm4, 1.0, %v1183_v61  ;;  %v328_v43 = vsel %vm320_vm5, 1.0, %v1183_v61 }
 0x17a   : > { %v592_v49 = vsub.f32 1.0, %v584_v59  ;;  %v601_v54 = vmul.f32 %v593_v21, %v329_v34  ;;  %v535_v39 = vadd.f32 0.2548296, %v527_v3  ;;  %vm319_vm7 = vcmp.ge.f32.partialorder %v1313_v40, 0.0 }
 0x17b   : > { %v586_v45 = vmul.f32 %v1059_v29, %v546_v13  ;;  %v502_v27 = vadd.f32 1.4214138, %v494_v47  ;;  %v306_v22 = vmul.f32 0.5, %v1400_v56  ;;  %1062 = vpow2.f32 %v566_v30  ;;  %v668_v47 = vpop.permute.xlu0 %667 }
 0x17c   : > { %v600_v6 = vmul.f32 %v592_v49, %v328_v43  ;;  %v543_v50 = vmul.f32 %v535_v39, %v1547_v14  ;;  %v1061_v0 = vpop.eup %1060  ;;  %v609_v32 = vadd.f32 1.0, %v601_v54  ;;  %v305_v10 = vmul.f32 0.5, %v1351_v12  ;;  %v670_v49 = vpop.permute.xlu1 %669 }
 0x17d   : > { %v594_v57 = vsub.f32 1.0, %v586_v45  ;;  %v510_v60 = vmul.f32 %v502_v27, %v371_v15  ;;  %v327_v14 = vsel %vm319_vm7, 1.0, %v1183_v61  ;;  %v304_v24 = vmul.f32 0.5, %v1318_v52  ;;  %v672_v43 = vpop.permute.xlu2 %671 }
 0x17e   : > { %v583_v7 = vmul.f32 %v1061_v0, %v543_v50  ;;  %v608_v46 = vadd.f32 1.0, %v600_v6  ;;  %v1610_v40 = vmul.f32 %v609_v32, %v305_v10  ;;  %v303_v11 = vmul.f32 0.5, %v1308_v36 }
 0x17f   : > { %v602_v62 = vmul.f32 %v594_v57, %v330_v2  ;;  %v518_v35 = vadd.f32 -0.28449672, %v510_v60  ;;  %vm318_vm8 = vcmp.ge.f32.partialorder %v1300_v25, 0.0  ;;  %v302_v18 = vmul.f32 0.5, %v1297_v23 }
 0x180   : > { %v591_v41 = vsub.f32 1.0, %v583_v7  ;;  %v1614_v12 = vmul.f32 %v608_v46, %v304_v24  ;;  %v326_v26 = vsel %vm318_vm8, 1.0, %v1183_v61  ;;  %vm623_vm9 = vcmask 523264  }
 0x181   : > { %v610_v28 = vadd.f32 1.0, %v602_v62  ;;  %v526_v19 = vmul.f32 %v518_v35, %v371_v15  ;;  %v1063_v16 = vpop.eup %1062  ;;  %vm647_vm10 = vcmask 474112   ;;  %vm683_vm11 = vcmask 64512   ;;  %v749_v35 = vld [vmem:[#allocation4 + $0x48] sm:$0xf] }
 0x182   : > { %v599_v56 = vmul.f32 %v591_v41, %v327_v14  ;;  %v1184_v10 = vmov 64   ;;  %vm827_vm1 = vcmask 470016   ;;  %vm831_vm2 = vcmask 1043456  }
 0x183   : > { %v1605_v31 = vmul.f32 %v610_v28, %v306_v22  ;;  %v534_v8 = vadd.f32 0.2548296, %v526_v19  ;;  %v674_v54 = vpop.permute.xlu0 %673  ;;  %1030 = vset.pattern.permute.xlu2 %v1184_v10  ;;  %1031 = vset.pattern.permute.xlu0 %v1184_v10  ;;  %vm855_vm3 = vcmask 7168   ;;  %vm857_vm4 = vcmask 8192  }
 0x184   : > { %v607_v51 = vadd.f32 1.0, %v599_v56  ;;  %v680_v27 = vpop.permute.xlu1 %679  ;;  %752 = vperm.xlu2 %1030, %v749_v35  }
 0x185   : > { %638 = vmatpush.msrb.mxu1 %v1605_v31  ;;  %v542_v48 = vmul.f32 %v534_v8, %v371_v15  ;;  %v676_v62 = vpop.permute.xlu2 %675 }
 0x186   : > { %v1618_v52 = vmul.f32 %v607_v51, %v303_v11 }
 0x187   : > { %639 = vmatpush.msrb.mxu1 %v1610_v40  ;;  %v582_v17 = vmul.f32 %v1063_v16, %v542_v48 }
 0x189   : > { %640 = vmatpush.msrb.mxu1 %v1614_v12  ;;  %v590_v38 = vsub.f32 1.0, %v582_v17 }
 0x18b   : > { %641 = vmatpush.msrb.mxu1 %v1618_v52  ;;  %v598_v36 = vmul.f32 %v590_v38, %v326_v26  ;;  %v682_v2 = vpop.permute.xlu0 %681 }
 0x18c   : > { %v678_v6 = vpop.permute.xlu1 %677 }
 0x18d   : > { %v606_v20 = vadd.f32 1.0, %v598_v36 }
 0x18f   : > { %v1623_v53 = vmul.f32 %v606_v20, %v302_v18 }
 0x191   : > { %642 = vmatpush.msrb.mxu1 %v1623_v53 }
 0x192   : > { %945 = vmatmul.msk.f32.vlgmr.msrb.gmra.mxu1 %vm623_vm9, %v622_v63 }
 0x1de   : > { %v753_v11 = vpop.permute.xlu2 %752 }
 0x20f   : > { %v644_v25 = vpop.f32.mrf.mxu1 }
 0x210   : > { %v648_v15 = vsel %vm647_vm10, %v644_v25, -inf }
 0x211   : > { %v649_v55 = vrot.slane %v648_v15, 4 }
 0x213   : > { %v650_v33 = vmax.f32 %v648_v15, %v649_v55 }
 0x215   : > { %v651_v5 = vrot.slane %v650_v33, 2 }
 0x217   : > { %v652_v58 = vmax.f32 %v650_v33, %v651_v5 }
 0x219   : > { %v653_v13 = vrot.slane %v652_v58, 1 }
 0x21b   : > { %v654_v21 = vmax.f32 %v652_v58, %v653_v13 }
 0x21d   : > { %v655_v37 = vsub.f32 %v644_v25, %v654_v21 }
 0x21f   : > { %v656_v23 = vmul.f32 1.442695, %v655_v37 }
 0x221   : > { %1064 = vpow2.f32 %v656_v23 }
 0x227   : > { %v1065_v9 = vpop.eup %1064 }
 0x228   : > { %v658_v29 = vsel %vm647_vm10, %v1065_v9, 0.0 }
 0x229   : > { %v659_v44 = vrot.slane %v658_v29, 4 }
 0x22b   : > { %v660_v59 = vadd.f32 %v659_v44, %v658_v29 }
 0x22d   : > { %v661_v45 = vrot.slane %v660_v59, 2 }
 0x22f   : > { %v662_v3 = vadd.f32 %v661_v45, %v660_v59 }
 0x231   : > { %v663_v34 = vrot.slane %v662_v3, 1 }
 0x233   : > { %v664_v57 = vadd.f32 %v663_v34, %v662_v3 }
 0x235   : > { %1066 = vrcp.f32 %v664_v57 }
 0x23b   : > { %v1067_v39 = vpop.eup %1066 }
 0x23c   : > { %v666_v30 = vmul.f32 %v1067_v39, %v1065_v9  ;;  %v839_v39 = vld [vmem:[#allocation4 + $0x44] sm:$0xf] }
 0x23e   : > { %715 = vmatpush.msra.mxu2 %v666_v30  ;;  %964 = vmatpush.msra.mxu3 %v666_v30 }
 0x23f   : > { %946 = vmatmul.msk.f32.vlgmr.msra.gmra.mxu2 %vm683_vm11, %v668_v47  ;;  %952 = vmatmul.msk.f32.vlgmr.msra.gmra.mxu3 %vm683_vm11, %v680_v27 }
 0x247   : > { %947 = vmatmul.msk.f32.gmra.mxu2 %vm683_vm11, %v670_v49  ;;  %953 = vmatmul.msk.f32.gmra.mxu3 %vm683_vm11, %v682_v2 }
 0x24f   : > { %948 = vmatmul.msk.f32.gmra.mxu2 %vm683_vm11, %v672_v43 }
 0x257   : > { %949 = vmatmul.msk.f32.gmra.mxu2 %vm683_vm11, %v674_v54  ;;  %v817_v54 = vld [vmem:[#allocation4 + $0x40] sm:$0xf] }
 0x25f   : > { %950 = vmatmul.msk.f32.gmra.mxu2 %vm683_vm11, %v676_v62 }
 0x267   : > { %951 = vmatmul.msk.f32.gmra.mxu2 %vm683_vm11, %v678_v6 }
 0x2c2   : > { %v717_v50 = vpop.f32.mrf.mxu2  ;;  %v735_v60 = vpop.f32.mrf.mxu3 }
 0x2c3   : > { %v747_v32 = vmul.f32 %v735_v60, %v1574_v42  ;;  %v741_v8 = vmul.f32 %v717_v50, %v1623_v53 }
 0x2ca   : > { %v720_v0 = vpop.f32.mrf.mxu2  ;;  %v738_v22 = vpop.f32.mrf.mxu3 }
 0x2cb   : > { %v748_v28 = vmul.f32 %v738_v22, %v1567_v1  ;;  %v742_v56 = vmul.f32 %v720_v0, %v1618_v52 }
 0x2cd   : > { %765 = vmatpush.msrb.mxu3 %v748_v28 }
 0x2cf   : > { %766 = vmatpush.msrb.mxu3 %v747_v32 }
 0x2d2   : > { %v723_v7 = vpop.f32.mrf.mxu2 }
 0x2d3   : > { %v743_v42 = vmul.f32 %v723_v7, %v1614_v12 }
 0x2da   : > { %v726_v46 = vpop.f32.mrf.mxu2 }
 0x2db   : > { %v744_v1 = vmul.f32 %v726_v46, %v1610_v40 }
 0x2e2   : > { %v729_v41 = vpop.f32.mrf.mxu2 }
 0x2e3   : > { %v745_v24 = vmul.f32 %v729_v41, %v1605_v31 }
 0x2ea   : > { %v732_v19 = vpop.f32.mrf.mxu2 }
 0x2eb   : > { %v746_v14 = vmul.f32 %v732_v19, %v1584_v4 }
 0x2ed   : > { %767 = vmatpush.msrb.mxu3 %v746_v14 }
 0x2ef   : > { %768 = vmatpush.msrb.mxu3 %v745_v24 }
 0x2f1   : > { %769 = vmatpush.msrb.mxu3 %v744_v1 }
 0x2f3   : > { %770 = vmatpush.msrb.mxu3 %v743_v42 }
 0x2f5   : > { %771 = vmatpush.msrb.mxu3 %v742_v56 }
 0x2f7   : > { %772 = vmatpush.msrb.mxu3 %v741_v8 }
 0x2f8   : > { %954 = vmatmul.msk.f32.vlgmr.msrb.gmra.mxu3 %vm623_vm9, %v749_v35 }
 0x37b   : > { %v774_v4 = vpop.f32.mrf.mxu3 }
 0x37c   : > { %v775_v51 = vadd.f32 %v774_v4, %v753_v11 }
 0x37e   : > { %v778_v31 = vmul.f32 0.70710677, %v775_v51  ;;  %v777_v34 = vmul.f32 0.5, %v775_v51 }
 0x380   : > { %v781_v48 = vand.u32 2147483647, %v778_v31  ;;  %vm779_vm0 = vcmp.ge.f32.partialorder %v778_v31, 0.0 }
 0x381   : > { %v780_v3 = vsel %vm779_vm0, 1.0, %v1183_v61 }
 0x382   : > { %v782_v16 = vmul.f32 0.3275911, %v781_v48  ;;  %v808_v63 = vsub.f32 0.0, %v781_v48 }
 0x384   : > { %v783_v40 = vadd.f32 1.0, %v782_v16  ;;  %v809_v33 = vmul.f32 %v808_v63, %v781_v48 }
 0x386   : > { %1068 = vrcp.f32 %v783_v40  ;;  %v795_v26 = vand.u32 2147483648, %v783_v40  ;;  %v793_v36 = vand.u32 2147483647, %v783_v40  ;;  %vm789_vm13 = vweird.f32 %v783_v40 }
 0x387   : > { %v810_v13 = vmul.f32 1.442695, %v809_v33 }
 0x388   : > { %v796_v20 = vor.u32 1.1754944e-38, %v795_v26  ;;  %vm794_vm15 = vcmp.eq.f32.partialorder %v793_v36, 8.507059e+37 }
 0x389   : > { %1070 = vpow2.f32 %v810_v13 }
 0x38c   : > { %v1069_v17 = vpop.eup %1068 }
 0x38d   : > { %v785_v12 = vmul.f32 %v1069_v17, %v783_v40  ;;  %vm790_vm12 = vweird.f32 %v1069_v17 }
 0x38e   : > { %vm791_vm14 = vmor %vm789_vm13, %vm790_vm12 }
 0x38f   : > { %v786_v38 = vsub.f32 1.0, %v785_v12  ;;  %v1071_v44 = vpop.eup %1070 }
 0x391   : > { %v787_v52 = vmul.f32 %v1069_v17, %v786_v38 }
 0x393   : > { %v788_v18 = vadd.f32 %v1069_v17, %v787_v52 }
 0x395   : > { %v792_v53 = vsel %vm791_vm14, %v1069_v17, %v788_v18 }
 0x396   : > { %v797_v25 = vsel %vm794_vm15, %v796_v20, %v792_v53 }
 0x397   : > { %v799_v15 = vmul.f32 1.0614054, %v797_v25 }
 0x399   : > { %v800_v55 = vadd.f32 -1.4531521, %v799_v15 }
 0x39b   : > { %v801_v5 = vmul.f32 %v800_v55, %v797_v25 }
 0x39d   : > { %v802_v58 = vadd.f32 1.4214138, %v801_v5 }
 0x39f   : > { %v803_v21 = vmul.f32 %v802_v58, %v797_v25 }
 0x3a1   : > { %v804_v37 = vadd.f32 -0.28449672, %v803_v21 }
 0x3a3   : > { %v805_v23 = vmul.f32 %v804_v37, %v797_v25 }
 0x3a5   : > { %v806_v9 = vadd.f32 0.2548296, %v805_v23 }
 0x3a7   : > { %v807_v29 = vmul.f32 %v806_v9, %v797_v25 }
 0x3a9   : > { %v812_v59 = vmul.f32 %v1071_v44, %v807_v29 }
 0x3ab   : > { %v813_v45 = vsub.f32 1.0, %v812_v59 }
 0x3ad   : > { %v814_v47 = vmul.f32 %v813_v45, %v780_v3 }
 0x3af   : > { %v815_v49 = vadd.f32 1.0, %v814_v47 }
 0x3b1   : > { %v816_v57 = vmul.f32 %v815_v49, %v777_v34 }
 0x3b3   : > { %819 = vrot.lane.b32.xlu0 %v816_v57, %s1182_s26 }
 0x425   : > { %v820_v27 = vpop.permute.xlu0 %819 }
 0x426   : > { %v822_v30 = vmul.f32 %v820_v27, %v817_v54  ;;  %v840_v2 = vmul.f32 %v839_v39, %v820_v27 }
 0x428   : > { %824 = vrot.lane.b32.xlu1 %v822_v30, %s1182_s26  ;;  %842 = vrot.lane.b32.xlu2 %v840_v2, %s1182_s26 }
 0x482   : > { %v843_v43 = vpop.permute.xlu2 %842 }
 0x483   : > { %v845_v62 = vsel %vm827_vm1, %v843_v43, 0.0 }
 0x484   : > { %846 = vadd.xlane.f32.xlu1 %v845_v62 }
 0x49a   : > { %v825_v61 = vpop.permute.xlu1 %824 }
 0x49b   : > { %v828_v6 = vsel %vm827_vm1, %v825_v61, 0.0 }
 0x49c   : > { %829 = vadd.xlane.f32.xlu0 %v828_v6 }
 0x4f7   : > { %v847_v50 = vpop.xlane.xlu1 %846 }
 0x4f8   : > { %v848_v60 = vsel %vm831_vm2, %v847_v50, 0.0 }
 0x4f9   : > { %v849_v0 = vrot.slane %v848_v60, 4 }
 0x4fb   : > { %v850_v22 = vadd.f32 %v849_v0, %v848_v60 }
 0x4fd   : > { %v851_v28 = vrot.slane %v850_v22, 2 }
 0x4ff   : > { %v852_v10 = vadd.f32 %v851_v28, %v850_v22 }
 0x501   : > { %v853_v19 = vrot.slane %v852_v10, 1 }
 0x503   : > { %v854_v1 = vadd.f32 %v853_v19, %v852_v10 }
 0x50f   : > { %v830_v32 = vpop.xlane.xlu0 %829 }
 0x510   : > { %v832_v7 = vsel %vm831_vm2, %v830_v32, 0.0 }
 0x511   : > { %v833_v35 = vrot.slane %v832_v7, 4 }
 0x513   : > { %v834_v46 = vadd.f32 %v833_v35, %v832_v7 }
 0x515   : > { %v835_v41 = vrot.slane %v834_v46, 2 }
 0x517   : > { %v836_v14 = vadd.f32 %v835_v41, %v834_v46 }
 0x519   : > { %v837_v24 = vrot.slane %v836_v14, 1 }
 0x51b   : > { %v838_v42 = vadd.f32 %v837_v24, %v836_v14 }
 0x51d   : > { %v856_v56 = vsel %vm855_vm3, %v838_v42, %v854_v1 }
 0x51e   : > { %858 = vst.msk [vmem:[%s175_s7] sm:$0x1] %vm857_vm4, %v856_v56 }
 0x51f PF: > { %p13_p3 = scmp.ge.s32.totalorder %s1236_s22, 4   ;;  %s1682_s9 = smov %s1162_s10 }
 0x520   : > { %s1683_s10 = smov %s1166_s11  ;;  %s1684_s11 = smov %s1246_s25 }
 0x521   : > { %s1685_s12 = smov %s1236_s22  ;;  %15 = sbr.rel (!%p13_p3) target bundleno = 4 (0x4), region = 72 }
 0x526   :  { %876 = vsyncpa [#allocation3], 1 }
 0x527   :  { %878 = vsyncpa [#allocation3 + $0x1], 1 }
 0x528   :  { %879 = vsyncpa [#allocation5], 1 }

</bundles_post_ra>
